<compile_context>
chip_gen: v7x
topology: tpu7x:2x2x1
jax: 0.10.0
libtpu: 0.0.40
codegen_flags: <defaults>
</compile_context>

<pallas_src>
import jax
import jax.numpy as jnp
from jax.experimental import pallas as pl
from jax.experimental.pallas import tpu as pltpu


def _add_pos_kernel(x_ref, pos_ref, o_ref):
    # x_ref: (Rt, Ct) row tile; pos_ref: (1, Ct) — broadcasts over the rows.
    o_ref[...] = x_ref[...] + pos_ref[...]


def _round_up(x, m):
    return ((x + m - 1) // m) * m


def _chip_params():
    """(target_tile_bytes, scoped_vmem_cap_bytes) per TPU generation.

    The tile target amortizes the ~0.35 us per-grid-step overhead against each
    generation's HBM bandwidth; the cap bounds our scoped-VMEM request well
    under physical VMEM (64 MiB on v7x, 128 MiB on v5e/v6e).
    """
    kind = ""
    try:
        kind = jax.devices()[0].device_kind.lower()
    except Exception:
        pass
    vmem_phys = None
    try:
        vmem_phys = int(pltpu.get_tpu_info().vmem_capacity_bytes)
    except Exception:
        pass

    is_v7 = (vmem_phys is not None and vmem_phys <= (64 << 20)) or ("7" in kind)
    if is_v7:
        # ~3.2 TB/s HBM: 8 MiB tiles keep per-step overhead < ~10%.
        return 8 << 20, 48 << 20
    if "v5" in kind:
        # ~0.82 TB/s HBM: 2 MiB tiles already < 10% overhead; 16 MiB scoped default.
        return 2 << 20, 16 << 20
    if "v6" in kind:
        # ~1.3-1.4 TB/s HBM, 128 MiB physical VMEM.
        return 6 << 20, 40 << 20
    # Unknown generation: conservative, works everywhere.
    return 2 << 20, 16 << 20


def _pick_tiles(rows, cols, itemsize, target_bytes):
    """Pick a (Rt, Ct) block for the lane-dense (rows, cols) layout.

    Honors the TPU block constraint: a dim tiled below its full extent must be
    a multiple of 8 (second-to-last) / 128 (last); ragged cdiv tails are fine.
    """
    target_elems = max(1, target_bytes // itemsize)
    min_rt = 8 if rows > 8 else rows          # smallest legal sub-extent row tile
    pad_rt = max(min_rt, 8)                   # VMEM pads rows up to >= 8 sublanes
    if cols * pad_rt <= target_elems:
        ct = cols                             # whole rows fit: keep lane dim whole
        rt = target_elems // cols
        rt = rows if rt >= rows else max(min_rt, (rt // 8) * 8)
    else:
        rt = min_rt                           # even 8 full rows too big: tile cols
        ct = target_elems // pad_rt
        ct = cols if ct >= cols else max(128, (ct // 128) * 128)
    return rt, ct


def _maybe_split_for_megacore(rows, cols, rt, ct, itemsize):
    """If the whole op is one grid step but big enough to matter, split it in
    two so the parallel grid axes can shard across v7x's two TensorCores."""
    if pl.cdiv(rows, rt) * pl.cdiv(cols, ct) > 1:
        return rt, ct
    if rows * cols * itemsize < (1 << 20):
        return rt, ct                         # tiny op: splitting only adds overhead
    if rows >= 16:
        rt = _round_up(pl.cdiv(rows, 2), 8)
    elif cols >= 256:
        ct = _round_up(pl.cdiv(cols, 2), 128)
    return rt, ct


def position_embedding(x_class: jax.Array, pos_emb: jax.Array) -> jax.Array:
    """x_class: (B, S, D), pos_emb: (1, S, D). Returns x_class + pos_emb."""
    B, S, D = x_class.shape
    assert pos_emb.shape == (1, S, D), pos_emb.shape

    # NumPy/PyTorch-style type promotion (bf16 acts + f32 param -> f32 output).
    out_dtype = jnp.promote_types(x_class.dtype, pos_emb.dtype)
    itemsize = jnp.dtype(out_dtype).itemsize

    # Lane-dense flattening: rows = batch, cols = S*D (last dim -> 128 lanes).
    rows, cols = B, S * D
    x2d = x_class.astype(out_dtype).reshape(rows, cols)
    pos2d = pos_emb.astype(out_dtype).reshape(1, cols)

    target_bytes, vmem_cap = _chip_params()
    row_pad = 8 * max(1, 4 // itemsize)       # sublane packing granularity

    # Pick tiles; shrink if the (padded) double-buffered working set would
    # exceed the per-chip scoped-VMEM cap.
    while True:
        rt, ct = _pick_tiles(rows, cols, itemsize, target_bytes)
        rt, ct = _maybe_split_for_megacore(rows, cols, rt, ct, itemsize)
        x_tile_b = _round_up(rt, row_pad) * _round_up(ct, 128) * itemsize
        pos_tile_b = row_pad * _round_up(ct, 128) * itemsize
        # 2x input + 2x output (double buffered) + pos (budgeted double even
        # though its block index is constant; a pl.Buffered(1) pos spec would
        # free one copy) + margin for compiler scratch.
        vmem_need = 4 * x_tile_b + 2 * pos_tile_b + (4 << 20)
        if vmem_need <= vmem_cap or target_bytes <= (256 << 10):
            break
        target_bytes //= 2
    vmem_limit = min(max(vmem_need, 16 << 20), vmem_cap)

    n_r, n_c = pl.cdiv(rows, rt), pl.cdiv(cols, ct)

    out2d = pl.pallas_call(
        _add_pos_kernel,
        out_shape=jax.ShapeDtypeStruct((rows, cols), out_dtype),
        grid_spec=pltpu.PrefetchScalarGridSpec(
            num_scalar_prefetch=0,
            # Column axis outermost so the pos block (column-indexed only)
            # stays resident in VMEM across the inner row iterations.
            grid=(n_c, n_r),
            in_specs=[
                pl.BlockSpec((rt, ct), lambda c, r: (r, c)),
                pl.BlockSpec((1, ct), lambda c, r: (0, c)),
            ],
            out_specs=pl.BlockSpec((rt, ct), lambda c, r: (r, c)),
        ),
        compiler_params=pltpu.CompilerParams(
            dimension_semantics=("parallel", "parallel"),
            vmem_limit_bytes=int(vmem_limit),
        ),
        cost_estimate=pl.CostEstimate(
            flops=rows * cols,
            transcendentals=0,
            bytes_accessed=2 * rows * cols * itemsize + cols * itemsize,
        ),
        # Reuse x2d's HBM buffer for the output when the caller (jit) can
        # donate it; otherwise XLA inserts a defensive copy (caller's x_class
        # is never mutated).
        input_output_aliases={0: 0},
    )(x2d, pos2d)

    return out2d.reshape(B, S, D)


if __name__ == "__main__":
    # Small shapes consistent with the module: batch=2, seq_len=8, D=128.
    B, S, D = 2, 8, 128
    key = jax.random.PRNGKey(0)
    kx, kp = jax.random.split(key)

    x_class = jax.random.normal(kx, (B, S, D), dtype=jnp.float32)
    # Deterministic stand-in for nn.Parameter(torch.randn(1, seq_len, D)).
    pos_emb = jax.random.normal(kp, (1, S, D), dtype=jnp.float32)

    # Reference computed BEFORE the kernel call (donation hygiene).
    ref = x_class + pos_emb

    out = position_embedding(x_class, pos_emb)
    jax.block_until_ready(out)

    assert out.shape == (B, S, D) and out.dtype == ref.dtype
    assert jnp.allclose(out, ref, atol=1e-6, rtol=1e-6), "mismatch vs reference"
    print("KERNEL_OK")
</pallas_src>

<mosaic_0001>
module attributes {stable_mosaic.version = 11 : i64} {
  func.func @_add_pos_kernel(%arg0: i32, %arg1: i32, %arg2: memref<2x1024xf32, #tpu.memory_space<vmem>>, %arg3: memref<1x1024xf32, #tpu.memory_space<vmem>>, %arg4: memref<2x1024xf32, #tpu.memory_space<vmem>>) attributes {dimension_semantics = [#tpu.dimension_semantics<parallel>, #tpu.dimension_semantics<parallel>], iteration_bounds = array<i64: 1, 1>, scalar_prefetch = 0 : i64, scratch_operands = 0 : i64, tpu.core_type = #tpu.core_type<tc>, window_params = [{transform_indices = @transform_0, window_bounds = array<i64: 2, 1024>}, {transform_indices = @transform_1, window_bounds = array<i64: 1, 1024>}, {transform_indices = @transform_2, window_bounds = array<i64: 2, 1024>}]} {
    %c0 = arith.constant 0 : index
    %c0_0 = arith.constant 0 : index
    %0 = vector.load %arg2[%c0, %c0_0] : memref<2x1024xf32, #tpu.memory_space<vmem>>, vector<2x1024xf32>
    %c0_1 = arith.constant 0 : index
    %c0_2 = arith.constant 0 : index
    %1 = vector.load %arg3[%c0_1, %c0_2] : memref<1x1024xf32, #tpu.memory_space<vmem>>, vector<1x1024xf32>
    %2 = vector.broadcast %1 : vector<1x1024xf32> to vector<2x1024xf32>
    %3 = arith.addf %0, %2 : vector<2x1024xf32>
    %c0_3 = arith.constant 0 : index
    %c0_4 = arith.constant 0 : index
    %4 = vector.load %arg4[%c0_3, %c0_4] : memref<2x1024xf32, #tpu.memory_space<vmem>>, vector<2x1024xf32>
    tpu.vector_store %arg4[%c0_3, %c0_4], %3 {strides = array<i32>} : memref<2x1024xf32, #tpu.memory_space<vmem>>, vector<2x1024xf32>,
    return
  }
  func.func @transform_0(%arg0: i32, %arg1: i32) -> (i32, i32) {
    %c0_i32 = arith.constant 0 : i32
    return %arg1, %arg0 : i32, i32
  }
  func.func @transform_1(%arg0: i32, %arg1: i32) -> (i32, i32) {
    %c0_i32 = arith.constant 0 : i32
    %c0_i32_0 = arith.constant 0 : i32
    return %c0_i32, %arg0 : i32, i32
  }
  func.func @transform_2(%arg0: i32, %arg1: i32) -> (i32, i32) {
    %c0_i32 = arith.constant 0 : i32
    return %arg1, %arg0 : i32, i32
  }
}

</mosaic_0001>

<bundles_post_ra>
// kernel: tpu_custom_call.1
= control target key start
LH: loop header
LB: loop body
LE: loop exit
PB: predicated region body
PF: predicated region fallthrough
CT: control target
= control target key end

     0   :  { %7 = vsyncpa [#allocation3], 0  ;;  %s211_s0 = inlined_call_operand.hbm [shape: f32[2,1024], index: 0, kind: input, shape index: {}, may-alias: {0,2}]   ;;  %s212_s1 = inlined_call_operand.vmem [shape: f32[1,1024], index: 1, kind: input, shape index: {}]   ;;  %s213_s2 = inlined_call_operand.hbm [shape: f32[2,1024], index: 2, kind: output, shape index: {}, may-alias: {0,2}]  }
   0x1   :  { %8 = vsyncpa [#allocation4], 0  ;;  %s166_s9 = smov [#allocation2]   ;;  %s118_s13 = scalar_lea.hbm %s211_s0, 256 }
   0x2   :  { %s15_s10 = sshll.u32 %s166_s9, 4  ;;  %p119_p0 = scmp.ne.s32.totalorder %s211_s0, %s118_s13  ;;  %s16_s10 = int_to_ptr.vmem [resolvable:$true] %s15_s10 }
   0x3   :  { %p122_p1 = scmp.lt.u32.totalorder %s118_s13, %s211_s0 }
   0x5   :  { %p124_p2 = pnand %p122_p1, %p119_p0 }
   0x7   :  { %127 = shalt.err (!%p124_p2)
}
   0x8   :  { %s128_s18 = scalar_lea.vmem %s16_s10, 256  ;;  %p133_p4 = scmp.lt.s32.totalorder %s16_s10, %s16_s10 }
   0x9   :  { %p129_p3 = scmp.ne.s32.totalorder %s16_s10, %s128_s18  ;;  %p134_p5 = scmp.lt.s32.totalorder %s128_s18, %s128_s18 }
   0xb   :  { %p135_p6 = por %p134_p5, %p133_p4 }
   0xd   :  { %p136_p7 = pnand %p135_p6, %p129_p3 }
   0xf   :  { %139 = shalt.err (!%p136_p7)
}
  0x10   :  { %18 = dma.hbm_to_vmem [thread:$0]  %s211_s0, 256, %s16_s10, [#allocation3]  }
  0x11   :  { %162 = dma.done.wait [#allocation3], 256  }
  0x12   :  { %163 = vsyncadd [#allocation3], 4294967040  ;;  %v28_v0 = vlaneseq  ;;  %v167_v1 = vmov 1983009808   ;;  %v26_v13 = vld [vmem:[%s212_s1] sm:$0xff]  ;;  %v25_v33 = vld [vmem:[#allocation2 + $0x8] sm:$0xff] }
  0x13   :  { %v63_v2 = vunpack.c.l.s4 %v167_v1  ;;  %v24_v29 = vld [vmem:[#allocation2] sm:$0xff]  ;;  %s168_s0 = smov [#allocation5]  }
  0x14   :  { %v29_v3 = vshrl.u32 %v28_v0, 7  ;;  %s106_s1 = sshll.u32 %s168_s0, 4  ;;  %s107_s1 = int_to_ptr.vmem [resolvable:$true] %s106_s1 }
  0x15   :  { %v64_v4 = vunpack.c.0.s8 %v63_v2  ;;  %s140_s23 = scalar_lea.vmem %s107_s1, 256  ;;  %p145_p9 = scmp.lt.s32.totalorder %s107_s1, %s107_s1 }
  0x16   :  { %v30_v5 = vsub.s32 0, %v29_v3  ;;  %v34_v6 = vsub.s32 1, %v29_v3  ;;  %v38_v7 = vsub.s32 2, %v29_v3  ;;  %v42_v8 = vsub.s32 3, %v29_v3  ;;  %p141_p8 = scmp.ne.s32.totalorder %s107_s1, %s140_s23  ;;  %p146_p10 = scmp.lt.s32.totalorder %s140_s23, %s140_s23 }
  0x17   :  { %v46_v9 = vsub.s32 4, %v29_v3  ;;  %v50_v10 = vsub.s32 5, %v29_v3  ;;  %v54_v11 = vsub.s32 6, %v29_v3  ;;  %v58_v12 = vsub.s32 7, %v29_v3 }
  0x18   :  { %v67_v14 = vsub.s32 %v64_v4, %v29_v3  ;;  %v31_v15 = vrot.slane %v26_v13, %v30_v5  ;;  %v35_v16 = vrot.slane %v26_v13, %v34_v6  ;;  %v39_v17 = vrot.slane %v26_v13, %v38_v7  ;;  %p147_p11 = por %p146_p10, %p145_p9 }
  0x19   :  { %v43_v18 = vrot.slane %v26_v13, %v42_v8  ;;  %v47_v19 = vrot.slane %v26_v13, %v46_v9  ;;  %v51_v20 = vrot.slane %v26_v13, %v50_v10  ;;  %v55_v21 = vrot.slane %v26_v13, %v54_v11 }
  0x1a   :  { %v59_v22 = vrot.slane %v26_v13, %v58_v12  ;;  %v60_v23 = vcombine.low %v31_v15, %v35_v16  ;;  %p148_p12 = pnand %p147_p11, %p141_p8 }
  0x1b   :  { %v61_v24 = vcombine.low %v39_v17, %v43_v18  ;;  %v77_v25 = vcombine.low %v47_v19, %v51_v20 }
  0x1c   :  { %v78_v26 = vcombine.low %v55_v21, %v59_v22  ;;  %v68_v27 = vrot.slane %v60_v23, %v67_v14 }
  0x1d   :  { %v75_v28 = vrot.slane %v61_v24, %v67_v14  ;;  %v85_v30 = vrot.slane %v77_v25, %v67_v14 }
  0x1e   :  { %v92_v31 = vrot.slane %v78_v26, %v67_v14 }
  0x1f   :  { %v76_v32 = vcombine.low %v68_v27, %v75_v28 }
  0x20   :  { %v93_v34 = vcombine.low %v85_v30, %v92_v31 }
  0x21   :  { %v96_v35 = vadd.f32 %v76_v32, %v24_v29 }
  0x22   :  { %v97_v36 = vadd.f32 %v93_v34, %v25_v33 }
  0x23   :  { %98 = vst [vmem:[#allocation5] sm:$0xff] %v96_v35 }
  0x24   :  { %99 = vst [vmem:[#allocation5 + $0x8] sm:$0xff] %v97_v36 }
  0x25   :  { %151 = shalt.err (!%p148_p12)
}
  0x26   :  { %s152_s26 = scalar_lea.hbm %s213_s2, 256 }
  0x27   :  { %p153_p13 = scmp.ne.s32.totalorder %s213_s2, %s152_s26  ;;  %p156_p0 = scmp.lt.u32.totalorder %s152_s26, %s213_s2 }
  0x29   :  { %p158_p1 = pnand %p156_p0, %p153_p13 }
  0x2b   :  { %161 = shalt.err (!%p158_p1)
}
  0x2c   :  { %109 = dma.vmem_to_hbm [thread:$0]  %s107_s1, 256, %s213_s2, [#allocation4]  }
  0x2d   :  { %164 = dma.done.wait [#allocation4], 256  }
  0x2e   :  { %165 = vsyncadd [#allocation4], 4294967040 }
  0x2f   :  { %113 = vsyncpa [#allocation3], 1 }
  0x30   :  { %114 = vsyncpa [#allocation4], 1 }

</bundles_post_ra>
